<compile_context>
chip_gen: v7x
topology: tpu7x:2x2x1
jax: 0.10.0
libtpu: 0.0.40
codegen_flags: <defaults>
</compile_context>

<pallas_src>
import functools

import jax
import jax.numpy as jnp
from jax.experimental import pallas as pl
from jax.experimental.pallas import tpu as pltpu

_IGNORE_INDEX = -100
_NEG_FILL = -1e30  # class-axis padding value; exp() underflows to exactly 0


def _ce_kernel(logits_ref, labels_ref, psum_ref):
    # logits_ref: (TILE_N, C_pad) input dtype; labels_ref: (TILE_N, 1) int32
    logits = logits_ref[...].astype(jnp.float32)
    labels = labels_ref[...]

    # Numerically stable shifted log-sum-exp per row.
    m = jnp.max(logits, axis=-1, keepdims=True)                          # (TILE_N, 1)
    shifted = logits - m                                                 # (TILE_N, C_pad)
    lse = jnp.log(jnp.sum(jnp.exp(shifted), axis=-1, keepdims=True))     # (TILE_N, 1)

    # Gather the true-class (shifted) logit via a compare/select on the shifted
    # values; padded columns (>= real C) are never selected since labels < C.
    col = jax.lax.broadcasted_iota(jnp.int32, shifted.shape, 1)
    true_shifted = jnp.sum(jnp.where(col == labels, shifted, 0.0),
                           axis=-1, keepdims=True)                       # (TILE_N, 1)

    per_example = lse - true_shifted                                     # (TILE_N, 1)

    # Rows with label == ignore_index (includes batch-padding rows) contribute 0.
    valid = labels != _IGNORE_INDEX
    psum = jnp.sum(jnp.where(valid, per_example, 0.0), keepdims=True)    # (1, 1)

    # Lane-dense output block: broadcast the tile's partial sum over (1, 8, 128).
    psum_ref[...] = jnp.broadcast_to(psum, psum_ref.shape)


def _round_up(x: int, m: int) -> int:
    return ((x + m - 1) // m) * m


def _choose_tile_n(n: int, c_pad: int, itemsize: int) -> int:
    # Target ~4 MiB per input buffer (x2 for double buffering) -> fits the scoped
    # VMEM default on all generations (16 MiB v5e, 32 MiB v6e/v7x) while being
    # large enough (>=512 rows when C allows) to sit near the HBM roofline.
    target_bytes = 4 * 1024 * 1024
    rows = max(8, target_bytes // max(1, c_pad * itemsize))
    tile = max(8, min(1024, (rows // 8) * 8))
    # Don't blow a tiny batch up to a huge padded tile.
    tile = min(tile, _round_up(n, 8))
    return max(8, tile)


@functools.partial(jax.jit, static_argnames=())
def cross_entropy_loss(y_pred: jax.Array, y_true: jax.Array) -> jax.Array:
    """Mean cross-entropy of (N, C) logits vs (N,) integer class indices.

    Matches torch.nn.CrossEntropyLoss() defaults (mean over non-ignored rows,
    ignore_index=-100). Out-of-range labels other than -100 are undefined
    behavior (PyTorch raises; here they would contribute a true-logit of 0).
    """
    n, c = y_pred.shape
    itemsize = jnp.dtype(y_pred.dtype).itemsize

    c_pad = _round_up(c, 128)
    tile_n = _choose_tile_n(n, c_pad, itemsize)
    n_pad = _round_up(n, tile_n)
    num_tiles = n_pad // tile_n

    logits = y_pred
    if c_pad > c:  # pad classes with a huge negative -> exp() contributes 0
        logits = jnp.pad(logits, ((0, 0), (0, c_pad - c)), constant_values=_NEG_FILL)
    if n_pad > n:  # pad rows with zeros; masked out via ignore_index labels
        logits = jnp.pad(logits, ((0, n_pad - n), (0, 0)))

    labels = y_true.astype(jnp.int32).reshape(n, 1)
    if n_pad > n:
        labels = jnp.pad(labels, ((0, n_pad - n), (0, 0)),
                         constant_values=_IGNORE_INDEX)

    partial = pl.pallas_call(
        _ce_kernel,
        out_shape=jax.ShapeDtypeStruct((num_tiles, 8, 128), jnp.float32),
        grid=(num_tiles,),
        in_specs=[
            pl.BlockSpec((tile_n, c_pad), lambda i: (i, 0)),  # logits tile
            pl.BlockSpec((tile_n, 1), lambda i: (i, 0)),      # labels tile
        ],
        out_specs=pl.BlockSpec((1, 8, 128), lambda i: (i, 0, 0)),
        compiler_params=pltpu.CompilerParams(
            dimension_semantics=("parallel",),
            vmem_limit_bytes=32 * 1024 * 1024,
        ),
    )(logits, labels)

    total = jnp.sum(partial[:, 0, 0])
    count = jnp.sum(y_true.astype(jnp.int32) != _IGNORE_INDEX).astype(jnp.float32)
    return total / count


if __name__ == "__main__":
    key = jax.random.PRNGKey(0)
    k_logits, k_labels = jax.random.split(key)

    N, C = 8, 32
    y_pred = jax.random.normal(k_logits, (N, C), dtype=jnp.float32)
    y_true = jax.random.randint(k_labels, (N,), 0, C, dtype=jnp.int32)

    loss = cross_entropy_loss(y_pred, y_true)
    jax.block_until_ready(loss)

    # Reference: same semantics as nn.CrossEntropyLoss (mean reduction).
    per_ex = (jax.nn.logsumexp(y_pred, axis=-1)
              - jnp.take_along_axis(y_pred, y_true[:, None], axis=-1)[:, 0])
    ref = jnp.mean(per_ex)
    assert jnp.allclose(loss, ref, atol=1e-5, rtol=1e-5), (loss, ref)

    # ignore_index=-100 rows are excluded from numerator and denominator.
    y_true_ign = y_true.at[0].set(-100)
    loss_ign = cross_entropy_loss(y_pred, y_true_ign)
    jax.block_until_ready(loss_ign)
    ref_ign = jnp.sum(per_ex[1:]) / (N - 1)
    assert jnp.allclose(loss_ign, ref_ign, atol=1e-5, rtol=1e-5), (loss_ign, ref_ign)

    print("KERNEL_OK")
</pallas_src>

<mosaic_0001>
module attributes {stable_mosaic.version = 11 : i64} {
  func.func @_ce_kernel(%arg0: i32, %arg1: memref<8x128xf32, #tpu.memory_space<vmem>>, %arg2: memref<8x1xi32, #tpu.memory_space<vmem>>, %arg3: memref<1x8x128xf32, #tpu.memory_space<vmem>>) attributes {dimension_semantics = [#tpu.dimension_semantics<parallel>], iteration_bounds = array<i64: 1>, scalar_prefetch = 0 : i64, scratch_operands = 0 : i64, tpu.core_type = #tpu.core_type<tc>, window_params = [{transform_indices = @transform_0, window_bounds = array<i64: 8, 128>}, {transform_indices = @transform_1, window_bounds = array<i64: 8, 1>}, {transform_indices = @transform_2, window_bounds = array<i64: 1, 8, 128>}]} {
    %c0 = arith.constant 0 : index
    %c0_0 = arith.constant 0 : index
    %0 = vector.load %arg1[%c0, %c0_0] : memref<8x128xf32, #tpu.memory_space<vmem>>, vector<8x128xf32>
    %c0_1 = arith.constant 0 : index
    %c0_2 = arith.constant 0 : index
    %1 = vector.load %arg2[%c0_1, %c0_2] : memref<8x1xi32, #tpu.memory_space<vmem>>, vector<8x1xi32>
    %cst = arith.constant dense<0xFF800000> : vector<8xf32>
    %2 = vector.multi_reduction <maximumf>, %0, %cst [1] : vector<8x128xf32> to vector<8xf32>
    %3 = vector.shape_cast %2 : vector<8xf32> to vector<8x1xf32>
    %4 = vector.broadcast %3 : vector<8x1xf32> to vector<8x128xf32>
    %5 = arith.subf %0, %4 : vector<8x128xf32>
    %6 = math.exp %5 : vector<8x128xf32>
    %cst_3 = arith.constant dense<0.000000e+00> : vector<8xf32>
    %7 = vector.multi_reduction <add>, %6, %cst_3 [1] : vector<8x128xf32> to vector<8xf32>
    %8 = vector.shape_cast %7 : vector<8xf32> to vector<8x1xf32>
    %9 = math.log %8 : vector<8x1xf32>
    %10 = tpu.iota {dimensions = array<i32: 1>} : vector<8x128xi32>
    %11 = vector.broadcast %1 : vector<8x1xi32> to vector<8x128xi32>
    %12 = arith.cmpi eq, %10, %11 : vector<8x128xi32>
    %cst_4 = arith.constant 0.000000e+00 : f32
    %13 = vector.broadcast %cst_4 : f32 to vector<8x128xf32>
    %14 = arith.select %12, %5, %13 : vector<8x128xi1>, vector<8x128xf32>
    %cst_5 = arith.constant dense<0.000000e+00> : vector<8xf32>
    %15 = vector.multi_reduction <add>, %14, %cst_5 [1] : vector<8x128xf32> to vector<8xf32>
    %16 = vector.shape_cast %15 : vector<8xf32> to vector<8x1xf32>
    %17 = arith.subf %9, %16 : vector<8x1xf32>
    %c-100_i32 = arith.constant -100 : i32
    %18 = vector.broadcast %c-100_i32 : i32 to vector<8x1xi32>
    %19 = arith.cmpi ne, %1, %18 : vector<8x1xi32>
    %cst_6 = arith.constant 0.000000e+00 : f32
    %20 = vector.broadcast %cst_6 : f32 to vector<8x1xf32>
    %21 = arith.select %19, %17, %20 : vector<8x1xi1>, vector<8x1xf32>
    %22 = vector.shape_cast %21 : vector<8x1xf32> to vector<1x8x1xf32>
    %cst_7 = arith.constant dense<0.000000e+00> : vector<1xf32>
    %23 = vector.multi_reduction <add>, %22, %cst_7 [1, 2] : vector<1x8x1xf32> to vector<1xf32>
    %24 = vector.shape_cast %23 : vector<1xf32> to vector<1x1x1xf32>
    %25 = vector.extract %24[0, 0, 0] : f32 from vector<1x1x1xf32>
    %26 = vector.broadcast %25 : f32 to vector<1x1xf32>
    %27 = vector.shape_cast %26 : vector<1x1xf32> to vector<1x1x1xf32>
    %28 = vector.broadcast %27 : vector<1x1x1xf32> to vector<1x8x128xf32>
    %c0_8 = arith.constant 0 : index
    %c0_9 = arith.constant 0 : index
    %c0_10 = arith.constant 0 : index
    %29 = vector.load %arg3[%c0_8, %c0_9, %c0_10] : memref<1x8x128xf32, #tpu.memory_space<vmem>>, vector<1x8x128xf32>
    tpu.vector_store %arg3[%c0_8, %c0_9, %c0_10], %28 {strides = array<i32>} : memref<1x8x128xf32, #tpu.memory_space<vmem>>, vector<1x8x128xf32>,
    return
  }
  func.func @transform_0(%arg0: i32) -> (i32, i32) {
    %c0_i32 = arith.constant 0 : i32
    %c0_i32_0 = arith.constant 0 : i32
    return %arg0, %c0_i32 : i32, i32
  }
  func.func @transform_1(%arg0: i32) -> (i32, i32) {
    %c0_i32 = arith.constant 0 : i32
    %c0_i32_0 = arith.constant 0 : i32
    return %arg0, %c0_i32 : i32, i32
  }
  func.func @transform_2(%arg0: i32) -> (i32, i32, i32) {
    %c0_i32 = arith.constant 0 : i32
    %c0_i32_0 = arith.constant 0 : i32
    %c0_i32_1 = arith.constant 0 : i32
    return %arg0, %c0_i32, %c0_i32_0 : i32, i32, i32
  }
}

</mosaic_0001>

<bundles_post_ra>
// kernel: cross_entropy_loss.1
= control target key start
LH: loop header
LB: loop body
LE: loop exit
PB: predicated region body
PF: predicated region fallthrough
CT: control target
= control target key end

     0   :  { %v59_v1 = vmov 0   ;;  %v22_v6 = vlaneseq  ;;  %vm34_vm2 = vcmask 7168   ;;  %s84_s0 = inlined_call_operand.vmem [shape: f32[8,128], index: 0, kind: input, shape index: {}]   ;;  %s85_s1 = inlined_call_operand.vmem [shape: s32[8,1], index: 1, kind: input, shape index: {}]   ;;  %s86_s2 = inlined_call_operand.vmem [shape: f32[1,8,128], index: 2, kind: output, shape index: {}]  }
   0x1   :  { %v11_v0 = vld [vmem:[%s84_s0] sm:$0xff]  ;;  %54 = vset.pattern.permute.xlu0 %v59_v1 }
   0x2   :  { %13 = vmax.xlane.f32.xlu0 %v11_v0  ;;  %v12_v2 = vld [vmem:[%s85_s1] sm:$0xff]  ;;  %v23_v7 = vand.u32 127, %v22_v6 }
   0x3   :  { %vm32_vm1 = vcmp.ne.s32.totalorder %v12_v2, 4294967196 }
  0x18   :  { %25 = vperm.xlu0 %54, %v12_v2  }
  0x8f   :  { %v14_v3 = vpop.xlane.xlu0 %13 }
  0x90   :  { %v15_v4 = vsub.f32 %v11_v0, %v14_v3 }
  0x92   :  { %v16_v5 = vmul.f32 1.442695, %v15_v4 }
  0x94   :  { %55 = vpow2.f32 %v16_v5 }
  0x97   :  { %v26_v8 = vpop.permute.xlu0 %25 }
  0x98   :  { %vm27_vm0 = vcmp.eq.s32.totalorder %v23_v7, %v26_v8 }
  0x99   :  { %v28_v10 = vsel %vm27_vm0, %v15_v4, 0.0 }
  0x9e   :  { %v56_v9 = vpop.eup %55 }
  0x9f   :  { %18 = vadd.xlane.f32.xlu1 %v56_v9 }
  0xa3   :  { %29 = vadd.xlane.f32.xlu1 %v28_v10 }
 0x12c   :  { %v19_v11 = vpop.xlane.xlu1 %18 }
 0x12d   :  { %57 = vlog2.f32 %v19_v11 }
 0x130   :  { %v30_v14 = vpop.xlane.xlu1 %29 }
 0x137   :  { %v58_v12 = vpop.eup %57 }
 0x138   :  { %v21_v13 = vmul.f32 0.6931472, %v58_v12 }
 0x13a   :  { %v31_v15 = vsub.f32 %v21_v13, %v30_v14 }
 0x13c   :  { %v33_v16 = vsel %vm32_vm1, %v31_v15, 0.0 }
 0x13d   :  { %v35_v17 = vsel %vm34_vm2, %v33_v16, 0.0 }
 0x13e   :  { %36 = vadd.xlane.f32.xlu1 %v35_v17 }
 0x1cb   :  { %v37_v18 = vpop.xlane.xlu1 %36 }
 0x1cc   :  { %v38_v19 = vrot.slane %v37_v18, 4 }
 0x1ce   :  { %v39_v20 = vadd.f32 %v38_v19, %v37_v18 }
 0x1d0   :  { %v40_v21 = vrot.slane %v39_v20, 2 }
 0x1d2   :  { %v41_v22 = vadd.f32 %v40_v21, %v39_v20 }
 0x1d4   :  { %v42_v23 = vrot.slane %v41_v22, 1 }
 0x1d6   :  { %v43_v24 = vadd.f32 %v42_v23, %v41_v22 }
 0x1d8   :  { %51 = vpush %v43_v24 }
 0x209   :  { %s52_s0 = spop %51 }
 0x20a   :  { %v45_v25 = vstv %s52_s0 }
 0x20b   :  { %46 = vst [vmem:[%s86_s2] sm:$0xff] %v45_v25 }

</bundles_post_ra>
